<compile_context>
chip_gen: v7x
topology: tpu7x:2x2x1
jax: 0.10.0
libtpu: 0.0.40
codegen_flags: <defaults>
</compile_context>

<pallas_src>
import jax
import jax.numpy as jnp
from jax.experimental import pallas as pl
from jax.experimental.pallas import tpu as pltpu

LANE = 128
SUBLANE = 8


def _round_up(x, m):
    return ((x + m - 1) // m) * m


def _pad2d(a, rows, cols):
    r, c = a.shape
    return jnp.pad(a, ((0, rows - r), (0, cols - c)))


def value_net_kernel(obs_ref,
                     w1_ref, b1_ref,
                     w2_ref, b2_ref,
                     w3_ref, b3_ref,
                     w4_ref, b4_ref,
                     out_ref):
    x = obs_ref[...]                                                          # (TILE_B, ob_pad)
    h = jnp.tanh(jnp.dot(x, w1_ref[...],
                         preferred_element_type=jnp.float32) + b1_ref[...])   # (TILE_B, 128)
    h = jnp.tanh(jnp.dot(h, w2_ref[...],
                         preferred_element_type=jnp.float32) + b2_ref[...])   # (TILE_B, 128)
    h = jnp.tanh(jnp.dot(h, w3_ref[...],
                         preferred_element_type=jnp.float32) + b3_ref[...])   # (TILE_B, 128)
    out_ref[...] = (jnp.dot(h, w4_ref[...],
                            preferred_element_type=jnp.float32) + b4_ref[...])  # (TILE_B, out_pad)


def value_net_forward(obs, params, *, tile_b=128):
    """obs: (B, ob_dim) float32;  params: dict with w1..w4 (in,out) and b1..b4 (1,out)."""
    obs = obs.astype(jnp.float32)
    B, ob_dim = obs.shape
    value_dim = params["w4"].shape[1]

    # Lane-pad all feature dims to 128.
    ob_pad = _round_up(ob_dim, LANE)
    h1_pad = _round_up(100, LANE)
    h2_pad = _round_up(50, LANE)
    h3_pad = _round_up(25, LANE)
    out_pad = _round_up(value_dim, LANE)

    # Batch tile: fill the MXU M dimension when B is large; for tiny B use one tile
    # rounded up to a sublane multiple.
    if B <= tile_b:
        TILE_B = _round_up(max(B, 1), SUBLANE)
    else:
        TILE_B = tile_b
    B_pad = _round_up(B, TILE_B)
    grid = (B_pad // TILE_B,)

    obs_p = jnp.pad(obs, ((0, B_pad - B), (0, ob_pad - ob_dim)))
    w1 = _pad2d(params["w1"], ob_pad, h1_pad)
    b1 = _pad2d(params["b1"], 1, h1_pad)
    w2 = _pad2d(params["w2"], h1_pad, h2_pad)
    b2 = _pad2d(params["b2"], 1, h2_pad)
    w3 = _pad2d(params["w3"], h2_pad, h3_pad)
    b3 = _pad2d(params["b3"], 1, h3_pad)
    w4 = _pad2d(params["w4"], h3_pad, out_pad)
    b4 = _pad2d(params["b4"], 1, out_pad)

    const = lambda i: (0, 0)   # weights/biases stay resident in VMEM across grid steps
    in_specs = [
        pl.BlockSpec((TILE_B, ob_pad), lambda i: (i, 0)),   # obs: streamed over batch
        pl.BlockSpec((ob_pad, h1_pad), const),
        pl.BlockSpec((1, h1_pad), const),
        pl.BlockSpec((h1_pad, h2_pad), const),
        pl.BlockSpec((1, h2_pad), const),
        pl.BlockSpec((h2_pad, h3_pad), const),
        pl.BlockSpec((1, h3_pad), const),
        pl.BlockSpec((h3_pad, out_pad), const),
        pl.BlockSpec((1, out_pad), const),
    ]
    out_specs = pl.BlockSpec((TILE_B, out_pad), lambda i: (i, 0))

    flops = 2 * B_pad * (ob_pad * h1_pad + h1_pad * h2_pad
                         + h2_pad * h3_pad + h3_pad * out_pad)
    transcendentals = B_pad * (h1_pad + h2_pad + h3_pad)
    bytes_accessed = 4 * (B_pad * (ob_pad + out_pad)
                          + ob_pad * h1_pad + h1_pad * h2_pad
                          + h2_pad * h3_pad + h3_pad * out_pad
                          + h1_pad + h2_pad + h3_pad + out_pad)

    out_padded = pl.pallas_call(
        value_net_kernel,
        out_shape=jax.ShapeDtypeStruct((B_pad, out_pad), jnp.float32),
        grid=grid,
        in_specs=in_specs,
        out_specs=out_specs,
        compiler_params=pltpu.CompilerParams(
            dimension_semantics=("parallel",)),
        cost_estimate=pl.CostEstimate(
            flops=flops,
            transcendentals=transcendentals,
            bytes_accessed=bytes_accessed),
    )(obs_p, w1, b1, w2, b2, w3, b3, w4, b4)

    return out_padded[:B, :value_dim]


def init_params(key, ob_dim, value_dim):
    """Deterministic init matching PyTorch Linear default U(-1/sqrt(in), 1/sqrt(in)).

    Weights stored as (in_features, out_features); biases as (1, out_features)."""
    dims = [(ob_dim, 100), (100, 50), (50, 25), (25, value_dim)]
    params = {}
    keys = jax.random.split(key, 2 * len(dims))
    for i, (din, dout) in enumerate(dims):
        bound = 1.0 / jnp.sqrt(din)
        params[f"w{i+1}"] = jax.random.uniform(
            keys[2 * i], (din, dout), jnp.float32, -bound, bound)
        params[f"b{i+1}"] = jax.random.uniform(
            keys[2 * i + 1], (1, dout), jnp.float32, -bound, bound)
    return params


def reference_forward(obs, params):
    h = jnp.tanh(obs @ params["w1"] + params["b1"])
    h = jnp.tanh(h @ params["w2"] + params["b2"])
    h = jnp.tanh(h @ params["w3"] + params["b3"])
    return h @ params["w4"] + params["b4"]


if __name__ == "__main__":
    key = jax.random.PRNGKey(0)
    k_obs, k_params, k_obs2 = jax.random.split(key, 3)

    # Small example consistent with the module.
    B, ob_dim, value_dim = 8, 16, 1
    params = init_params(k_params, ob_dim, value_dim)

    obs = jax.random.normal(k_obs, (B, ob_dim), jnp.float32)
    out = jax.block_until_ready(value_net_forward(obs, params))
    ref = reference_forward(obs, params)
    assert out.shape == (B, value_dim)
    assert jnp.allclose(out, ref, atol=1e-5, rtol=1e-5), "mismatch vs reference (small batch)"

    # Larger batch exercises the multi-block grid (tail padding + parallel batch axis).
    B2 = 300
    obs2 = jax.random.normal(k_obs2, (B2, ob_dim), jnp.float32)
    out2 = jax.block_until_ready(value_net_forward(obs2, params, tile_b=128))
    ref2 = reference_forward(obs2, params)
    assert out2.shape == (B2, value_dim)
    assert jnp.allclose(out2, ref2, atol=1e-5, rtol=1e-5), "mismatch vs reference (large batch)"

    print("KERNEL_OK")
</pallas_src>

<mosaic_0001>
module attributes {stable_mosaic.version = 11 : i64} {
  func.func @value_net_kernel(%arg0: i32, %arg1: memref<8x128xf32, #tpu.memory_space<vmem>>, %arg2: memref<128x128xf32, #tpu.memory_space<vmem>>, %arg3: memref<1x128xf32, #tpu.memory_space<vmem>>, %arg4: memref<128x128xf32, #tpu.memory_space<vmem>>, %arg5: memref<1x128xf32, #tpu.memory_space<vmem>>, %arg6: memref<128x128xf32, #tpu.memory_space<vmem>>, %arg7: memref<1x128xf32, #tpu.memory_space<vmem>>, %arg8: memref<128x128xf32, #tpu.memory_space<vmem>>, %arg9: memref<1x128xf32, #tpu.memory_space<vmem>>, %arg10: memref<8x128xf32, #tpu.memory_space<vmem>>) attributes {dimension_semantics = [#tpu.dimension_semantics<parallel>], iteration_bounds = array<i64: 1>, scalar_prefetch = 0 : i64, scratch_operands = 0 : i64, tpu.core_type = #tpu.core_type<tc>, window_params = [{transform_indices = @transform_0, window_bounds = array<i64: 8, 128>}, {pipeline_mode = #tpu.pipeline_mode<synchronous>, transform_indices = @transform_1, window_bounds = array<i64: 128, 128>}, {pipeline_mode = #tpu.pipeline_mode<synchronous>, transform_indices = @transform_2, window_bounds = array<i64: 1, 128>}, {pipeline_mode = #tpu.pipeline_mode<synchronous>, transform_indices = @transform_3, window_bounds = array<i64: 128, 128>}, {pipeline_mode = #tpu.pipeline_mode<synchronous>, transform_indices = @transform_4, window_bounds = array<i64: 1, 128>}, {pipeline_mode = #tpu.pipeline_mode<synchronous>, transform_indices = @transform_5, window_bounds = array<i64: 128, 128>}, {pipeline_mode = #tpu.pipeline_mode<synchronous>, transform_indices = @transform_6, window_bounds = array<i64: 1, 128>}, {pipeline_mode = #tpu.pipeline_mode<synchronous>, transform_indices = @transform_7, window_bounds = array<i64: 128, 128>}, {pipeline_mode = #tpu.pipeline_mode<synchronous>, transform_indices = @transform_8, window_bounds = array<i64: 1, 128>}, {transform_indices = @transform_9, window_bounds = array<i64: 8, 128>}]} {
    %c0 = arith.constant 0 : index
    %c0_0 = arith.constant 0 : index
    %0 = vector.load %arg1[%c0, %c0_0] : memref<8x128xf32, #tpu.memory_space<vmem>>, vector<8x128xf32>
    %c0_1 = arith.constant 0 : index
    %c0_2 = arith.constant 0 : index
    %1 = vector.load %arg2[%c0_1, %c0_2] : memref<128x128xf32, #tpu.memory_space<vmem>>, vector<128x128xf32>
    %cst = arith.constant dense<0.000000e+00> : vector<8x128xf32>
    %2 = tpu.matmul %0, %1, %cst {dimension_numbers = #tpu.dot_dimension_numbers<[1], [0], [0], [1], [0, 0, 1, 1], [], []>} : vector<8x128xf32>, vector<128x128xf32>, vector<8x128xf32> -> vector<8x128xf32>
    %c0_3 = arith.constant 0 : index
    %c0_4 = arith.constant 0 : index
    %3 = vector.load %arg3[%c0_3, %c0_4] : memref<1x128xf32, #tpu.memory_space<vmem>>, vector<1x128xf32>
    %4 = vector.broadcast %3 : vector<1x128xf32> to vector<8x128xf32>
    %5 = arith.addf %2, %4 : vector<8x128xf32>
    %6 = math.tanh %5 : vector<8x128xf32>
    %c0_5 = arith.constant 0 : index
    %c0_6 = arith.constant 0 : index
    %7 = vector.load %arg4[%c0_5, %c0_6] : memref<128x128xf32, #tpu.memory_space<vmem>>, vector<128x128xf32>
    %cst_7 = arith.constant dense<0.000000e+00> : vector<8x128xf32>
    %8 = tpu.matmul %6, %7, %cst_7 {dimension_numbers = #tpu.dot_dimension_numbers<[1], [0], [0], [1], [0, 0, 1, 1], [], []>} : vector<8x128xf32>, vector<128x128xf32>, vector<8x128xf32> -> vector<8x128xf32>
    %c0_8 = arith.constant 0 : index
    %c0_9 = arith.constant 0 : index
    %9 = vector.load %arg5[%c0_8, %c0_9] : memref<1x128xf32, #tpu.memory_space<vmem>>, vector<1x128xf32>
    %10 = vector.broadcast %9 : vector<1x128xf32> to vector<8x128xf32>
    %11 = arith.addf %8, %10 : vector<8x128xf32>
    %12 = math.tanh %11 : vector<8x128xf32>
    %c0_10 = arith.constant 0 : index
    %c0_11 = arith.constant 0 : index
    %13 = vector.load %arg6[%c0_10, %c0_11] : memref<128x128xf32, #tpu.memory_space<vmem>>, vector<128x128xf32>
    %cst_12 = arith.constant dense<0.000000e+00> : vector<8x128xf32>
    %14 = tpu.matmul %12, %13, %cst_12 {dimension_numbers = #tpu.dot_dimension_numbers<[1], [0], [0], [1], [0, 0, 1, 1], [], []>} : vector<8x128xf32>, vector<128x128xf32>, vector<8x128xf32> -> vector<8x128xf32>
    %c0_13 = arith.constant 0 : index
    %c0_14 = arith.constant 0 : index
    %15 = vector.load %arg7[%c0_13, %c0_14] : memref<1x128xf32, #tpu.memory_space<vmem>>, vector<1x128xf32>
    %16 = vector.broadcast %15 : vector<1x128xf32> to vector<8x128xf32>
    %17 = arith.addf %14, %16 : vector<8x128xf32>
    %18 = math.tanh %17 : vector<8x128xf32>
    %c0_15 = arith.constant 0 : index
    %c0_16 = arith.constant 0 : index
    %19 = vector.load %arg8[%c0_15, %c0_16] : memref<128x128xf32, #tpu.memory_space<vmem>>, vector<128x128xf32>
    %cst_17 = arith.constant dense<0.000000e+00> : vector<8x128xf32>
    %20 = tpu.matmul %18, %19, %cst_17 {dimension_numbers = #tpu.dot_dimension_numbers<[1], [0], [0], [1], [0, 0, 1, 1], [], []>} : vector<8x128xf32>, vector<128x128xf32>, vector<8x128xf32> -> vector<8x128xf32>
    %c0_18 = arith.constant 0 : index
    %c0_19 = arith.constant 0 : index
    %21 = vector.load %arg9[%c0_18, %c0_19] : memref<1x128xf32, #tpu.memory_space<vmem>>, vector<1x128xf32>
    %22 = vector.broadcast %21 : vector<1x128xf32> to vector<8x128xf32>
    %23 = arith.addf %20, %22 : vector<8x128xf32>
    %c0_20 = arith.constant 0 : index
    %c0_21 = arith.constant 0 : index
    %24 = vector.load %arg10[%c0_20, %c0_21] : memref<8x128xf32, #tpu.memory_space<vmem>>, vector<8x128xf32>
    tpu.vector_store %arg10[%c0_20, %c0_21], %23 {strides = array<i32>} : memref<8x128xf32, #tpu.memory_space<vmem>>, vector<8x128xf32>,
    return
  }
  func.func @transform_0(%arg0: i32) -> (i32, i32) {
    %c0_i32 = arith.constant 0 : i32
    %c0_i32_0 = arith.constant 0 : i32
    return %arg0, %c0_i32 : i32, i32
  }
  func.func @transform_1(%arg0: i32) -> (i32, i32) {
    %c0_i32 = arith.constant 0 : i32
    %c0_i32_0 = arith.constant 0 : i32
    %c0_i32_1 = arith.constant 0 : i32
    return %c0_i32, %c0_i32_0 : i32, i32
  }
  func.func @transform_2(%arg0: i32) -> (i32, i32) {
    %c0_i32 = arith.constant 0 : i32
    %c0_i32_0 = arith.constant 0 : i32
    %c0_i32_1 = arith.constant 0 : i32
    return %c0_i32, %c0_i32_0 : i32, i32
  }
  func.func @transform_3(%arg0: i32) -> (i32, i32) {
    %c0_i32 = arith.constant 0 : i32
    %c0_i32_0 = arith.constant 0 : i32
    %c0_i32_1 = arith.constant 0 : i32
    return %c0_i32, %c0_i32_0 : i32, i32
  }
  func.func @transform_4(%arg0: i32) -> (i32, i32) {
    %c0_i32 = arith.constant 0 : i32
    %c0_i32_0 = arith.constant 0 : i32
    %c0_i32_1 = arith.constant 0 : i32
    return %c0_i32, %c0_i32_0 : i32, i32
  }
  func.func @transform_5(%arg0: i32) -> (i32, i32) {
    %c0_i32 = arith.constant 0 : i32
    %c0_i32_0 = arith.constant 0 : i32
    %c0_i32_1 = arith.constant 0 : i32
    return %c0_i32, %c0_i32_0 : i32, i32
  }
  func.func @transform_6(%arg0: i32) -> (i32, i32) {
    %c0_i32 = arith.constant 0 : i32
    %c0_i32_0 = arith.constant 0 : i32
    %c0_i32_1 = arith.constant 0 : i32
    return %c0_i32, %c0_i32_0 : i32, i32
  }
  func.func @transform_7(%arg0: i32) -> (i32, i32) {
    %c0_i32 = arith.constant 0 : i32
    %c0_i32_0 = arith.constant 0 : i32
    %c0_i32_1 = arith.constant 0 : i32
    return %c0_i32, %c0_i32_0 : i32, i32
  }
  func.func @transform_8(%arg0: i32) -> (i32, i32) {
    %c0_i32 = arith.constant 0 : i32
    %c0_i32_0 = arith.constant 0 : i32
    %c0_i32_1 = arith.constant 0 : i32
    return %c0_i32, %c0_i32_0 : i32, i32
  }
  func.func @transform_9(%arg0: i32) -> (i32, i32) {
    %c0_i32 = arith.constant 0 : i32
    %c0_i32_0 = arith.constant 0 : i32
    return %arg0, %c0_i32 : i32, i32
  }
}

</mosaic_0001>

<bundles_post_ra>
// kernel: tpu_custom_call.1
= control target key start
LH: loop header
LB: loop body
LE: loop exit
PB: predicated region body
PF: predicated region fallthrough
CT: control target
= control target key end

     0   :  { %14 = vsyncpa [#allocation3], 0  ;;  %s1155_s0 = inlined_call_operand.hbm [shape: f32[8,128], index: 0, kind: input, shape index: {}]   ;;  %s1156_s1 = inlined_call_operand.hbm [shape: f32[128,128], index: 1, kind: input, shape index: {}]   ;;  %s1157_s2 = inlined_call_operand.vmem [shape: f32[1,128], index: 2, kind: input, shape index: {}]   ;;  %s1158_s3 = inlined_call_operand.hbm [shape: f32[128,128], index: 3, kind: input, shape index: {}]   ;;  %s1159_s4 = inlined_call_operand.vmem [shape: f32[1,128], index: 4, kind: input, shape index: {}]   ;;  %s1160_s5 = inlined_call_operand.hbm [shape: f32[128,128], index: 5, kind: input, shape index: {}]   ;;  %s1161_s6 = inlined_call_operand.vmem [shape: f32[1,128], index: 6, kind: input, shape index: {}]   ;;  %s1162_s7 = inlined_call_operand.hbm [shape: f32[128,128], index: 7, kind: input, shape index: {}]   ;;  %s1163_s8 = inlined_call_operand.vmem [shape: f32[1,128], index: 8, kind: input, shape index: {}]   ;;  %s1164_s9 = inlined_call_operand.hbm [shape: f32[8,128], index: 9, kind: output, shape index: {}]  }
   0x1   :  { %15 = vsyncpa [#allocation6], 0 }
   0x2   :  { %16 = vsyncpa [#allocation9], 0 }
   0x3   :  { %17 = vsyncpa [#allocation4], 0  ;;  %s958_s30 = smov [#allocation5]   ;;  %s818_s13 = scalar_lea.hbm %s1156_s1, 2048 }
   0x4   :  { %s33_s10 = sshll.u32 %s958_s30, 4  ;;  %p819_p0 = scmp.ne.s32.totalorder %s1156_s1, %s818_s13  ;;  %s34_s10 = int_to_ptr.vmem [resolvable:$true] %s33_s10 }
   0x5   :  { %p822_p1 = scmp.lt.u32.totalorder %s818_s13, %s1156_s1 }
   0x7   :  { %p824_p2 = pnand %p822_p1, %p819_p0 }
   0x9   :  { %827 = shalt.err (!%p824_p2)
}
   0xa   :  { %s828_s18 = scalar_lea.vmem %s34_s10, 2048  ;;  %p833_p4 = scmp.lt.s32.totalorder %s34_s10, %s34_s10 }
   0xb   :  { %p829_p3 = scmp.ne.s32.totalorder %s34_s10, %s828_s18  ;;  %p834_p5 = scmp.lt.s32.totalorder %s828_s18, %s828_s18 }
   0xd   :  { %p835_p6 = por %p834_p5, %p833_p4 }
   0xf   :  { %p836_p7 = pnand %p835_p6, %p829_p3 }
  0x11   :  { %839 = shalt.err (!%p836_p7)
}
  0x12   :  { %s959_s19 = smov 128   ;;  %s960_s20 = smov 8  }
  0x13   :  { %39 = dma.hbm_to_vmem [thread:$0]  %s1156_s1, 2048, %s34_s10, [#allocation6], %s959_s19, %s959_s19, %s960_s20  }
  0x14   :  { %s961_s23 = smov [#allocation8]   ;;  %s962_s25 = smov [#allocation2]  }
  0x15   :  { %s61_s24 = sshll.u32 %s961_s23, 4  ;;  %s24_s26 = sshll.u32 %s962_s25, 4  ;;  %s62_s24 = int_to_ptr.vmem [resolvable:$true] %s61_s24  ;;  %s25_s26 = int_to_ptr.vmem [resolvable:$true] %s24_s26 }
  0x16   :  { %s840_s29 = scalar_lea.hbm %s1160_s5, 2048 }
  0x17   :  { %p841_p8 = scmp.ne.s32.totalorder %s1160_s5, %s840_s29  ;;  %p844_p9 = scmp.lt.u32.totalorder %s840_s29, %s1160_s5 }
  0x19   :  { %p846_p10 = pnand %p844_p9, %p841_p8 }
  0x1b   :  { %849 = shalt.err (!%p846_p10)
}
  0x1c   :  { %s850_s1 = scalar_lea.vmem %s62_s24, 2048  ;;  %p855_p12 = scmp.lt.s32.totalorder %s62_s24, %s62_s24 }
  0x1d   :  { %p851_p11 = scmp.ne.s32.totalorder %s62_s24, %s850_s1  ;;  %p856_p13 = scmp.lt.s32.totalorder %s850_s1, %s850_s1 }
  0x1f   :  { %p857_p0 = por %p856_p13, %p855_p12 }
  0x21   :  { %p858_p1 = pnand %p857_p0, %p851_p11 }
  0x23   :  { %861 = shalt.err (!%p858_p1)
}
  0x24   :  { %67 = dma.hbm_to_vmem [thread:$0]  %s1160_s5, 2048, %s62_s24, [#allocation9], %s959_s19, %s959_s19, %s960_s20  }
  0x25   :  { %s862_s17 = scalar_lea.hbm %s1155_s0, 128 }
  0x26   :  { %p863_p2 = scmp.ne.s32.totalorder %s1155_s0, %s862_s17  ;;  %p866_p3 = scmp.lt.u32.totalorder %s862_s17, %s1155_s0 }
  0x28   :  { %p868_p4 = pnand %p866_p3, %p863_p2 }
  0x2a   :  { %871 = shalt.err (!%p868_p4)
}
  0x2b   :  { %s872_s25 = scalar_lea.vmem %s25_s26, 128  ;;  %p877_p6 = scmp.lt.s32.totalorder %s25_s26, %s25_s26 }
  0x2c   :  { %p873_p5 = scmp.ne.s32.totalorder %s25_s26, %s872_s25  ;;  %p878_p7 = scmp.lt.s32.totalorder %s872_s25, %s872_s25 }
  0x2e   :  { %p879_p8 = por %p878_p7, %p877_p6 }
  0x30   :  { %p880_p9 = pnand %p879_p8, %p873_p5 }
  0x32   :  { %883 = shalt.err (!%p880_p9)
}
  0x33   :  { %27 = dma.hbm_to_vmem [thread:$0]  %s1155_s0, 128, %s25_s26, [#allocation3]  }
  0x34   :  { %s963_s27 = smov [#allocation7]   ;;  %s964_s29 = smov [#allocation10]  }
  0x35   :  { %s47_s28 = sshll.u32 %s963_s27, 4  ;;  %s75_s30 = sshll.u32 %s964_s29, 4  ;;  %s48_s28 = int_to_ptr.vmem [resolvable:$true] %s47_s28  ;;  %s76_s30 = int_to_ptr.vmem [resolvable:$true] %s75_s30 }
  0x36   :  { %s884_s13 = scalar_lea.hbm %s1158_s3, 2048 }
  0x37   :  { %p885_p10 = scmp.ne.s32.totalorder %s1158_s3, %s884_s13  ;;  %p888_p11 = scmp.lt.u32.totalorder %s884_s13, %s1158_s3 }
  0x39   :  { %p890_p12 = pnand %p888_p11, %p885_p10 }
  0x3b   :  { %893 = shalt.err (!%p890_p12)
}
  0x3c   :  { %s894_s0 = scalar_lea.vmem %s48_s28, 2048  ;;  %p899_p0 = scmp.lt.s32.totalorder %s48_s28, %s48_s28 }
  0x3d   :  { %p895_p13 = scmp.ne.s32.totalorder %s48_s28, %s894_s0  ;;  %p900_p1 = scmp.lt.s32.totalorder %s894_s0, %s894_s0 }
  0x3f   :  { %p901_p2 = por %p900_p1, %p899_p0 }
  0x41   :  { %p902_p3 = pnand %p901_p2, %p895_p13 }
  0x43   :  { %905 = shalt.err (!%p902_p3)
}
  0x44   :  { %53 = dma.hbm_to_vmem [thread:$0]  %s1158_s3, 2048, %s48_s28, [#allocation6], %s959_s19, %s959_s19, %s960_s20  }
  0x45   :  { %s906_s21 = scalar_lea.hbm %s1162_s7, 2048 }
  0x46   :  { %p907_p4 = scmp.ne.s32.totalorder %s1162_s7, %s906_s21  ;;  %p910_p5 = scmp.lt.u32.totalorder %s906_s21, %s1162_s7 }
  0x48   :  { %p912_p6 = pnand %p910_p5, %p907_p4 }
  0x4a   :  { %915 = shalt.err (!%p912_p6)
}
  0x4b   :  { %s916_s24 = scalar_lea.vmem %s76_s30, 2048  ;;  %p921_p8 = scmp.lt.s32.totalorder %s76_s30, %s76_s30 }
  0x4c   :  { %p917_p7 = scmp.ne.s32.totalorder %s76_s30, %s916_s24  ;;  %p922_p9 = scmp.lt.s32.totalorder %s916_s24, %s916_s24 }
  0x4e   :  { %p923_p10 = por %p922_p9, %p921_p8 }
  0x50   :  { %p924_p11 = pnand %p923_p10, %p917_p7 }
  0x52   :  { %927 = shalt.err (!%p924_p11)
}
  0x53   :  { %81 = dma.hbm_to_vmem [thread:$0]  %s1162_s7, 2048, %s76_s30, [#allocation9], %s959_s19, %s959_s19, %s960_s20  }
  0x54   :  { %950 = dma.done.wait [#allocation3], 128  }
  0x55   :  { %951 = vsyncadd [#allocation3], 4294967168 }
  0x56   :  { %952 = dma.done.wait [#allocation6], 4096  }
  0x57   :  { %953 = vsyncadd [#allocation6], 4294963200 }
  0x58   :  { %954 = dma.done.wait [#allocation9], 4096  }
  0x59   :  { %955 = vsyncadd [#allocation9], 4294963200  ;;  %v965_v0 = vmov 0.0|0.0   ;;  %vm966_vm0 = vmmov 0   ;;  %v967_v1 = vmov 0.0   ;;  %v100_v2 = vld [vmem:[#allocation5] sm:$0xff] }
  0x5a   :  { %705 = vmatprep.subr.bf16.mxu0 %v965_v0  ;;  %597 = vmatprep.mubr.msk.f32.mxu0 %vm966_vm0, %v967_v1  ;;  %v101_v3 = vld [vmem:[#allocation5 + $0x8] sm:$0xff]  ;;  %v102_v4 = vld [vmem:[#allocation5 + $0x10] sm:$0xff]  ;;  %v103_v6 = vld [vmem:[#allocation5 + $0x18] sm:$0xff]  ;;  %s968_s11 = smov [#allocation11]  }
  0x5b   :  { %729 = vmatprep.subr.bf16.mxu1 %v965_v0  ;;  %632 = vmatprep.mubr.msk.f32.mxu1 %vm966_vm0, %v967_v1  ;;  %v706_v5 = vpack.c.bf16 %v101_v3, %v100_v2  ;;  %v709_v7 = vpack.c.bf16 %v103_v6, %v102_v4  ;;  %v104_v8 = vld [vmem:[#allocation5 + $0x20] sm:$0xff]  ;;  %v105_v9 = vld [vmem:[#allocation5 + $0x28] sm:$0xff]  ;;  %v196_v12 = vld [vmem:[#allocation7 + $0x10] sm:$0xff]  ;;  %s482_s12 = sshll.u32 %s968_s11, 4  ;;  %s483_s12 = int_to_ptr.vmem [resolvable:$true] %s482_s12 }
  0x5c   :  { %v194_v10 = vld [vmem:[#allocation7] sm:$0xff]  ;;  %v195_v11 = vld [vmem:[#allocation7 + $0x8] sm:$0xff]  ;;  %v197_v13 = vld [vmem:[#allocation7 + $0x18] sm:$0xff]  ;;  %v712_v14 = vpack.c.bf16 %v105_v9, %v104_v8  ;;  %s928_s13 = scalar_lea.vmem %s483_s12, 128  ;;  %p933_p13 = scmp.lt.s32.totalorder %s483_s12, %s483_s12 }
  0x5d   :  { %707 = vmatpush3.bf16.msra.mxu0 %v706_v5  ;;  %v730_v15 = vpack.c.bf16 %v195_v11, %v194_v10  ;;  %v106_v16 = vld [vmem:[#allocation5 + $0x30] sm:$0xff]  ;;  %v107_v17 = vld [vmem:[#allocation5 + $0x38] sm:$0xff]  ;;  %v733_v18 = vpack.c.bf16 %v197_v13, %v196_v12  ;;  %v198_v19 = vld [vmem:[#allocation7 + $0x20] sm:$0xff]  ;;  %p929_p12 = scmp.ne.s32.totalorder %s483_s12, %s928_s13  ;;  %p934_p0 = scmp.lt.s32.totalorder %s928_s13, %s928_s13 }
  0x5e   :  { %708 = vmatprep.subr.bf16.mxu0 %v965_v0  ;;  %v199_v20 = vld [vmem:[#allocation7 + $0x28] sm:$0xff]  ;;  %v715_v21 = vpack.c.bf16 %v107_v17, %v106_v16  ;;  %v108_v22 = vld [vmem:[#allocation5 + $0x40] sm:$0xff]  ;;  %v200_v25 = vld [vmem:[#allocation7 + $0x30] sm:$0xff] }
  0x5f   :  { %731 = vmatpush3.bf16.msra.mxu1 %v730_v15  ;;  %v109_v23 = vld [vmem:[#allocation5 + $0x48] sm:$0xff]  ;;  %v736_v24 = vpack.c.bf16 %v199_v20, %v198_v19  ;;  %v201_v26 = vld [vmem:[#allocation7 + $0x38] sm:$0xff]  ;;  %v110_v28 = vld [vmem:[#allocation5 + $0x50] sm:$0xff]  ;;  %p935_p1 = por %p934_p0, %p933_p13 }
  0x60   :  { %732 = vmatprep.subr.bf16.mxu1 %v965_v0  ;;  %v718_v27 = vpack.c.bf16 %v109_v23, %v108_v22  ;;  %v111_v29 = vld [vmem:[#allocation5 + $0x58] sm:$0xff]  ;;  %v739_v30 = vpack.c.bf16 %v201_v26, %v200_v25  ;;  %v202_v31 = vld [vmem:[#allocation7 + $0x40] sm:$0xff]  ;;  %v203_v32 = vld [vmem:[#allocation7 + $0x48] sm:$0xff] }
  0x61   :  { %710 = vmatpush3.bf16.msra.mxu0 %v709_v7  ;;  %v721_v33 = vpack.c.bf16 %v111_v29, %v110_v28  ;;  %v112_v34 = vld [vmem:[#allocation5 + $0x60] sm:$0xff]  ;;  %v113_v35 = vld [vmem:[#allocation5 + $0x68] sm:$0xff]  ;;  %v742_v36 = vpack.c.bf16 %v203_v32, %v202_v31  ;;  %v114_v38 = vld [vmem:[#allocation5 + $0x70] sm:$0xff]  ;;  %p936_p2 = pnand %p935_p1, %p929_p12 }
  0x62   :  { %711 = vmatprep.subr.bf16.mxu0 %v965_v0  ;;  %v724_v37 = vpack.c.bf16 %v113_v35, %v112_v34  ;;  %v115_v39 = vld [vmem:[#allocation5 + $0x78] sm:$0xff]  ;;  %v204_v42 = vld [vmem:[#allocation7 + $0x50] sm:$0xff]  ;;  %v206_v45 = vld [vmem:[#allocation7 + $0x60] sm:$0xff] }
  0x63   :  { %734 = vmatpush3.bf16.msra.mxu1 %v733_v18  ;;  %v727_v40 = vpack.c.bf16 %v115_v39, %v114_v38  ;;  %v99_v41 = vld [vmem:[#allocation2] sm:$0xff]  ;;  %v207_v46 = vld [vmem:[#allocation7 + $0x68] sm:$0xff]  ;;  %v208_v48 = vld [vmem:[#allocation7 + $0x70] sm:$0xff] }
  0x64   :  { %735 = vmatprep.subr.bf16.mxu1 %v965_v0  ;;  %v205_v43 = vld [vmem:[#allocation7 + $0x58] sm:$0xff]  ;;  %v748_v47 = vpack.c.bf16 %v207_v46, %v206_v45  ;;  %v288_v51 = vld [vmem:[#allocation8] sm:$0xff]  ;;  %v289_v52 = vld [vmem:[#allocation8 + $0x8] sm:$0xff] }
  0x65   :  { %713 = vmatpush3.bf16.msra.mxu0 %v712_v14  ;;  %v745_v44 = vpack.c.bf16 %v205_v43, %v204_v42  ;;  %v209_v49 = vld [vmem:[#allocation7 + $0x78] sm:$0xff]  ;;  %v290_v53 = vld [vmem:[#allocation8 + $0x10] sm:$0xff]  ;;  %v754_v54 = vpack.c.bf16 %v289_v52, %v288_v51  ;;  %v292_v57 = vld [vmem:[#allocation8 + $0x20] sm:$0xff] }
  0x66   :  { %714 = vmatprep.subr.bf16.mxu0 %v965_v0  ;;  %v751_v50 = vpack.c.bf16 %v209_v49, %v208_v48  ;;  %v291_v55 = vld [vmem:[#allocation8 + $0x18] sm:$0xff]  ;;  %v293_v58 = vld [vmem:[#allocation8 + $0x28] sm:$0xff]  ;;  %v294_v60 = vld [vmem:[#allocation8 + $0x30] sm:$0xff] }
  0x67   :  { %737 = vmatpush3.bf16.msra.mxu1 %v736_v24  ;;  %v757_v56 = vpack.c.bf16 %v291_v55, %v290_v53  ;;  %v760_v59 = vpack.c.bf16 %v293_v58, %v292_v57  ;;  %v295_v61 = vld [vmem:[#allocation8 + $0x38] sm:$0xff]  ;;  %v296_v63 = vld [vmem:[#allocation8 + $0x40] sm:$0xff]  ;;  %v297_v2 = vld [vmem:[#allocation8 + $0x48] sm:$0xff] }
  0x68   :  { %738 = vmatprep.subr.bf16.mxu1 %v965_v0  ;;  %v763_v62 = vpack.c.bf16 %v295_v61, %v294_v60  ;;  %v766_v3 = vpack.c.bf16 %v297_v2, %v296_v63  ;;  %v493_v4 = vld [vmem:[%s1157_s2] ss:$0 sm:$0xff]  ;;  %v298_v9 = vld [vmem:[#allocation8 + $0x50] sm:$0xff]  ;;  %v300_v12 = vld [vmem:[#allocation8 + $0x60] sm:$0xff] }
  0x69   :  { %716 = vmatpush3.bf16.msra.mxu0 %v715_v21  ;;  %v299_v10 = vld [vmem:[#allocation8 + $0x58] sm:$0xff]  ;;  %v301_v13 = vld [vmem:[#allocation8 + $0x68] sm:$0xff]  ;;  %v302_v15 = vld [vmem:[#allocation8 + $0x70] sm:$0xff] }
  0x6a   :  { %717 = vmatprep.subr.bf16.mxu0 %v965_v0  ;;  %v769_v11 = vpack.c.bf16 %v299_v10, %v298_v9  ;;  %v772_v14 = vpack.c.bf16 %v301_v13, %v300_v12  ;;  %v303_v16 = vld [vmem:[#allocation8 + $0x78] sm:$0xff]  ;;  %v382_v18 = vld [vmem:[#allocation10] sm:$0xff]  ;;  %v383_v19 = vld [vmem:[#allocation10 + $0x8] sm:$0xff] }
  0x6b   :  { %740 = vmatpush3.bf16.msra.mxu1 %v739_v30  ;;  %v775_v17 = vpack.c.bf16 %v303_v16, %v302_v15  ;;  %v384_v20 = vld [vmem:[#allocation10 + $0x10] sm:$0xff]  ;;  %v385_v21 = vld [vmem:[#allocation10 + $0x18] sm:$0xff]  ;;  %v386_v23 = vld [vmem:[#allocation10 + $0x20] sm:$0xff] }
  0x6c   :  { %741 = vmatprep.subr.bf16.mxu1 %v965_v0  ;;  %v781_v22 = vpack.c.bf16 %v385_v21, %v384_v20  ;;  %v387_v24 = vld [vmem:[#allocation10 + $0x28] sm:$0xff]  ;;  %v388_v26 = vld [vmem:[#allocation10 + $0x30] sm:$0xff]  ;;  %v390_v29 = vld [vmem:[#allocation10 + $0x40] sm:$0xff] }
  0x6d   :  { %719 = vmatpush3.bf16.msra.mxu0 %v718_v27  ;;  %v784_v25 = vpack.c.bf16 %v387_v24, %v386_v23  ;;  %v389_v27 = vld [vmem:[#allocation10 + $0x38] sm:$0xff]  ;;  %v391_v30 = vld [vmem:[#allocation10 + $0x48] sm:$0xff]  ;;  %v396_v43 = vld [vmem:[#allocation10 + $0x70] sm:$0xff] }
  0x6e   :  { %720 = vmatprep.subr.bf16.mxu0 %v965_v0  ;;  %v787_v28 = vpack.c.bf16 %v389_v27, %v388_v26  ;;  %v790_v31 = vpack.c.bf16 %v391_v30, %v390_v29  ;;  %v494_v32 = vld [vmem:[%s1159_s4] ss:$0 sm:$0xff] }
  0x6f   :  { %743 = vmatpush3.bf16.msra.mxu1 %v742_v36  ;;  %v393_v38 = vld [vmem:[#allocation10 + $0x58] sm:$0xff] }
  0x70   :  { %744 = vmatprep.subr.bf16.mxu1 %v965_v0  ;;  %v495_v46 = vld [vmem:[%s1161_s6] ss:$0 sm:$0xff] }
  0x71   :  { %722 = vmatpush3.bf16.msra.mxu0 %v721_v33  ;;  %v496_v51 = vld [vmem:[%s1163_s8] ss:$0 sm:$0xff] }
  0x72   :  { %723 = vmatprep.subr.bf16.mxu0 %v965_v0 }
  0x73   :  { %746 = vmatpush3.bf16.msra.mxu1 %v745_v44  ;;  %v397_v44 = vld [vmem:[#allocation10 + $0x78] sm:$0xff] }
  0x74   :  { %747 = vmatprep.subr.bf16.mxu1 %v965_v0  ;;  %v799_v45 = vpack.c.bf16 %v397_v44, %v396_v43 }
  0x75   :  { %725 = vmatpush3.bf16.msra.mxu0 %v724_v37  ;;  %v392_v37 = vld [vmem:[#allocation10 + $0x50] sm:$0xff] }
  0x76   :  { %726 = vmatprep.subr.bf16.mxu0 %v965_v0  ;;  %v793_v39 = vpack.c.bf16 %v393_v38, %v392_v37 }
  0x77   :  { %749 = vmatpush3.bf16.msra.mxu1 %v748_v47 }
  0x78   :  { %750 = vmatprep.subr.bf16.mxu1 %v965_v0 }
  0x79   :  { %728 = vmatpush3.bf16.msra.mxu0 %v727_v40  ;;  %v394_v40 = vld [vmem:[#allocation10 + $0x60] sm:$0xff] }
  0x7a   :  { %753 = vmatprep.subr.bf16.mxu0 %v965_v0 }
  0x7b   :  { %752 = vmatpush3.bf16.msra.mxu1 %v751_v50 }
  0x7c   :  { %598 = vmatmul.mubr.f32.vlgmr.msra.gmra.mrb[0].mxu0 %v99_v41  ;;  %777 = vmatprep.subr.bf16.mxu1 %v965_v0  ;;  %v395_v41 = vld [vmem:[#allocation10 + $0x68] sm:$0xff] }
  0x7d   :  { %667 = vmatprep.mubr.msk.f32.mxu0 %vm966_vm0, %v967_v1  ;;  %755 = vmatpush3.bf16.msra.mxu0 %v754_v54  ;;  %v796_v42 = vpack.c.bf16 %v395_v41, %v394_v40 }
  0x7e   :  { %756 = vmatprep.subr.bf16.mxu0 %v965_v0 }
  0x81   :  { %758 = vmatpush3.bf16.msra.mxu0 %v757_v56 }
  0x82   :  { %759 = vmatprep.subr.bf16.mxu0 %v965_v0 }
  0x85   :  { %761 = vmatpush3.bf16.msra.mxu0 %v760_v59 }
  0x86   :  { %762 = vmatprep.subr.bf16.mxu0 %v965_v0 }
  0x89   :  { %764 = vmatpush3.bf16.msra.mxu0 %v763_v62 }
  0x8a   :  { %765 = vmatprep.subr.bf16.mxu0 %v965_v0 }
  0x8d   :  { %767 = vmatpush3.bf16.msra.mxu0 %v766_v3 }
  0x8e   :  { %768 = vmatprep.subr.bf16.mxu0 %v965_v0 }
  0x91   :  { %770 = vmatpush3.bf16.msra.mxu0 %v769_v11 }
  0x92   :  { %771 = vmatprep.subr.bf16.mxu0 %v965_v0 }
  0x95   :  { %773 = vmatpush3.bf16.msra.mxu0 %v772_v14 }
  0x96   :  { %774 = vmatprep.subr.bf16.mxu0 %v965_v0 }
  0x99   :  { %776 = vmatpush3.bf16.msra.mxu0 %v775_v17 }
 0x14f   :  { %v189_v5 = vpop.f32.mrb[0].mxu0 }
 0x150   :  { %v190_v6 = vadd.f32 %v493_v4, %v189_v5  ;;  %v599_v7 = vpop.f32.mrb[1].mxu0 }
 0x152   :  { %812 = vtanh.f32 %v190_v6 }
 0x15c   :  { %v813_v8 = vpop.eup %812 }
 0x15d   :  { %633 = vmatmul.mubr.f32.vlgmr.msra.gmra.mrb[0].mxu1 %v813_v8 }
 0x15e   :  { %702 = vmatprep.mubr.msk.f32.mxu1 %vm966_vm0, %v967_v1  ;;  %v778_v1 = vpack.c.bf16 %v383_v19, %v382_v18 }
 0x160   :  { %779 = vmatpush3.bf16.msra.mxu1 %v778_v1 }
 0x161   :  { %780 = vmatprep.subr.bf16.mxu1 %v965_v0 }
 0x164   :  { %782 = vmatpush3.bf16.msra.mxu1 %v781_v22 }
 0x165   :  { %783 = vmatprep.subr.bf16.mxu1 %v965_v0 }
 0x168   :  { %785 = vmatpush3.bf16.msra.mxu1 %v784_v25 }
 0x169   :  { %786 = vmatprep.subr.bf16.mxu1 %v965_v0 }
 0x16c   :  { %788 = vmatpush3.bf16.msra.mxu1 %v787_v28 }
 0x16d   :  { %789 = vmatprep.subr.bf16.mxu1 %v965_v0 }
 0x170   :  { %791 = vmatpush3.bf16.msra.mxu1 %v790_v31 }
 0x171   :  { %792 = vmatprep.subr.bf16.mxu1 %v965_v0 }
 0x174   :  { %794 = vmatpush3.bf16.msra.mxu1 %v793_v39 }
 0x175   :  { %795 = vmatprep.subr.bf16.mxu1 %v965_v0 }
 0x178   :  { %797 = vmatpush3.bf16.msra.mxu1 %v796_v42 }
 0x179   :  { %798 = vmatprep.subr.bf16.mxu1 %v965_v0 }
 0x17c   :  { %800 = vmatpush3.bf16.msra.mxu1 %v799_v45 }
 0x230   :  { %v283_v33 = vpop.f32.mrb[0].mxu1 }
 0x231   :  { %v284_v34 = vadd.f32 %v494_v32, %v283_v33  ;;  %v634_v35 = vpop.f32.mrb[1].mxu1 }
 0x233   :  { %814 = vtanh.f32 %v284_v34 }
 0x23d   :  { %v815_v36 = vpop.eup %814 }
 0x23e   :  { %668 = vmatmul.mubr.f32.vlgmr.msra.gmra.mrb[2].mxu0 %v815_v36 }
 0x311   :  { %v377_v47 = vpop.f32.mrb[2].mxu0 }
 0x312   :  { %v378_v48 = vadd.f32 %v495_v46, %v377_v47  ;;  %v669_v49 = vpop.f32.mrb[3].mxu0 }
 0x314   :  { %816 = vtanh.f32 %v378_v48 }
 0x31e   :  { %v817_v50 = vpop.eup %816 }
 0x31f   :  { %703 = vmatmul.mubr.f32.vlgmr.msra.gmra.mrb[2].mxu1 %v817_v50 }
 0x3f2   :  { %v471_v52 = vpop.f32.mrb[2].mxu1 }
 0x3f3   :  { %v472_v53 = vadd.f32 %v496_v51, %v471_v52  ;;  %v704_v0 = vpop.f32.mrb[3].mxu1 }
 0x3f5   :  { %475 = vst [vmem:[#allocation11] sm:$0xff] %v472_v53 }
 0x3f6   :  { %939 = shalt.err (!%p936_p2)
}
 0x3f7   :  { %s940_s10 = scalar_lea.hbm %s1164_s9, 128 }
 0x3f8   :  { %p941_p3 = scmp.ne.s32.totalorder %s1164_s9, %s940_s10  ;;  %p944_p4 = scmp.lt.u32.totalorder %s940_s10, %s1164_s9 }
 0x3fa   :  { %p946_p5 = pnand %p944_p4, %p941_p3 }
 0x3fc   :  { %949 = shalt.err (!%p946_p5)
}
 0x3fd   :  { %485 = dma.vmem_to_hbm [thread:$0]  %s483_s12, 128, %s1164_s9, [#allocation4]  }
 0x3fe   :  { %956 = dma.done.wait [#allocation4], 128  }
 0x3ff   :  { %957 = vsyncadd [#allocation4], 4294967168 }
 0x400   :  { %489 = vsyncpa [#allocation3], 1 }
 0x401   :  { %490 = vsyncpa [#allocation6], 1 }
 0x402   :  { %491 = vsyncpa [#allocation9], 1 }
 0x403   :  { %492 = vsyncpa [#allocation4], 1 }

</bundles_post_ra>
